<compile_context>
chip_gen: v5e
topology: v5e:2x2
jax: 0.10.0
libtpu: 0.0.40
codegen_flags: <defaults>
</compile_context>

<pallas_src>
import functools
import math

import jax
import jax.numpy as jnp
from jax import lax
from jax.experimental import pallas as pl
from jax.experimental.pallas import tpu as pltpu


# ----------------------------- Pallas kernels ------------------------------

def _encoder_layer_kernel(*refs, num_heads, fused_qkv, apply_norm, eps):
    """One fused self-attention layer (+ optional LayerNorm epilogue).

    Refs (in order):
      xq_ref   : (1, tq, D) f32   query-tile activation block
      xkv_ref  : (1, S, D)  f32   full-sequence activation block
                                  (omitted when fused_qkv: xq IS the full seq)
      wqkv_ref : (D, 3D)    bf16  [Wq*scale | Wk | Wv], resident in VMEM
      bqkv_ref : (1, 3D)    f32   [bq*scale | bk | bv]
      wo_ref   : (D, D)     bf16  output projection weight
      bo_ref   : (1, D)     f32   output projection bias
      ln_ref   : (2,)       f32   SMEM scalars [alpha, bias] (only if apply_norm)
      o_ref    : (1, tq, D) f32   output block
      attn_ref : (tq, D)    f32   VMEM scratch: lane-dense packed head outputs
    """
    it = iter(refs)
    xq_ref = next(it)
    xkv_ref = xq_ref if fused_qkv else next(it)
    wqkv_ref = next(it)
    bqkv_ref = next(it)
    wo_ref = next(it)
    bo_ref = next(it)
    ln_ref = next(it) if apply_norm else None
    o_ref = next(it)
    attn_ref = next(it)

    xq = xq_ref[0]                                # (tq, D) f32
    tq, D = xq.shape
    d_k = D // num_heads

    wqkv = wqkv_ref[...]                          # (D, 3D) bf16
    bqkv = bqkv_ref[...]                          # (1, 3D) f32

    if fused_qkv:
        # tq == S: single fused QKV matmul, activation read once.
        qkv = jnp.dot(xq.astype(jnp.bfloat16), wqkv,
                      preferred_element_type=jnp.float32) + bqkv      # (tq, 3D)
        q = qkv[:, :D]
        k = qkv[:, D:2 * D]
        v = qkv[:, 2 * D:]
    else:
        # Query-tiled path: Q from the tile, K/V from the full sequence.
        xkv = xkv_ref[0]                          # (S, D) f32
        q = jnp.dot(xq.astype(jnp.bfloat16), wqkv[:, :D],
                    preferred_element_type=jnp.float32) + bqkv[:, :D]  # (tq, D)
        kv = jnp.dot(xkv.astype(jnp.bfloat16), wqkv[:, D:],
                     preferred_element_type=jnp.float32) + bqkv[:, D:]  # (S, 2D)
        k = kv[:, :D]
        v = kv[:, D:]

    # Per-head attention; 1/sqrt(d_k) is already folded into Wq/bq.
    # Head outputs go straight into the lane-dense (tq, D) VMEM slab.
    for h in range(num_heads):                    # static unroll (small h)
        lo = h * d_k
        qh = q[:, lo:lo + d_k].astype(jnp.bfloat16)
        kh = k[:, lo:lo + d_k].astype(jnp.bfloat16)
        vh = v[:, lo:lo + d_k].astype(jnp.bfloat16)

        # scores = q @ k^T without materialising a transpose of k.
        scores = lax.dot_general(qh, kh, (((1,), (1,)), ((), ())),
                                 preferred_element_type=jnp.float32)   # (tq, S)

        # Numerically stable softmax in f32; exact reciprocal on the EUP path.
        m = jnp.max(scores, axis=-1, keepdims=True)
        e = jnp.exp(scores - m)
        p = e * pl.reciprocal(jnp.sum(e, axis=-1, keepdims=True))

        attn_ref[:, lo:lo + d_k] = jnp.dot(p.astype(jnp.bfloat16), vh,
                                           preferred_element_type=jnp.float32)

    # Output projection on the lane-dense slab; single (tq, D) store.
    out = jnp.dot(attn_ref[...].astype(jnp.bfloat16), wo_ref[...],
                  preferred_element_type=jnp.float32) + bo_ref[...]    # (tq, D)

    if apply_norm:
        # Fused final LayerNormalization (torch semantics: unbiased std over
        # last dim, scalar alpha/bias, x/(std+eps)); math kept in f32.
        alpha = ln_ref[0]
        bias = ln_ref[1]
        mean = jnp.mean(out, axis=-1, keepdims=True)
        var = jnp.sum((out - mean) ** 2, axis=-1, keepdims=True) * (
            1.0 / (D - 1))                        # unbiased (torch .std())
        inv = pl.reciprocal(jnp.sqrt(var) + eps)
        out = alpha * (out - mean) * inv + bias

    o_ref[0] = out.astype(o_ref.dtype)


def _layernorm_kernel(x_ref, ab_ref, o_ref, *, eps):
    """Standalone LayerNormalization (only used if the layer stack is empty)."""
    x = x_ref[0]                                  # (S, D) f32
    D = x.shape[-1]
    alpha = ab_ref[0]
    bias = ab_ref[1]
    mean = jnp.mean(x, axis=-1, keepdims=True)
    var = jnp.sum((x - mean) ** 2, axis=-1, keepdims=True) * (1.0 / (D - 1))
    inv = pl.reciprocal(jnp.sqrt(var) + eps)
    o_ref[0] = alpha * (x - mean) * inv + bias


# ------------------------------ wrappers ------------------------------------

def prepare_encoder_params(layer_params, num_heads):
    """One-time parameter prep: fuse [Wq|Wk|Wv], fold 1/sqrt(d_k) into Wq/bq,
    and store matmul weights as bf16 (f32 accumulation happens in-kernel)."""
    prepared = []
    for p in layer_params:
        D = p["wq"].shape[0]
        d_k = D // num_heads
        scale = 1.0 / math.sqrt(d_k)
        wqkv = jnp.concatenate([p["wq"] * scale, p["wk"], p["wv"]],
                               axis=1).astype(jnp.bfloat16)            # (D, 3D)
        bqkv = jnp.concatenate([p["bq"] * scale, p["bk"], p["bv"]]
                               ).reshape(1, 3 * D).astype(jnp.float32)  # (1, 3D)
        wo = p["wo"].astype(jnp.bfloat16)                               # (D, D)
        bo = p["bo"].reshape(1, D).astype(jnp.float32)                  # (1, D)
        prepared.append(dict(wqkv=wqkv, bqkv=bqkv, wo=wo, bo=bo))
    return prepared


def mha_layer(x, p, num_heads, *, ln_ab=None, eps=1e-6, tq=None):
    """Fused self-attention layer (B, S, D) -> (B, S, D); one pallas_call.
    If ln_ab is given, the final LayerNormalization is fused as an epilogue."""
    B, S, D = x.shape
    if tq is None:
        tq = S if S <= 128 else 128
    assert S % tq == 0, "query tile must divide the sequence length"
    nq = S // tq
    fused_qkv = (tq == S)
    apply_norm = ln_ab is not None

    kernel = functools.partial(
        _encoder_layer_kernel, num_heads=num_heads, fused_qkv=fused_qkv,
        apply_norm=apply_norm, eps=eps)

    in_specs = [pl.BlockSpec((1, tq, D), lambda b, qi: (b, qi, 0))]
    inputs = [x]
    if not fused_qkv:
        # Full-sequence view for K/V (same array, different blocking).
        in_specs.append(pl.BlockSpec((1, S, D), lambda b, qi: (b, 0, 0)))
        inputs.append(x)
    # Constant-index weight blocks stay resident in VMEM across the grid.
    # TODO(synk): at production D, add pipeline_mode=pl.Buffered(1) here to
    # single-buffer these constant blocks (VMEM saver, mainly for v7x).
    in_specs += [
        pl.BlockSpec((D, 3 * D), lambda b, qi: (0, 0)),
        pl.BlockSpec((1, 3 * D), lambda b, qi: (0, 0)),
        pl.BlockSpec((D, D), lambda b, qi: (0, 0)),
        pl.BlockSpec((1, D), lambda b, qi: (0, 0)),
    ]
    inputs += [p["wqkv"], p["bqkv"], p["wo"], p["bo"]]
    if apply_norm:
        in_specs.append(pl.BlockSpec(memory_space=pltpu.MemorySpace.SMEM))
        inputs.append(ln_ab)

    return pl.pallas_call(
        kernel,
        out_shape=jax.ShapeDtypeStruct((B, S, D), jnp.float32),
        grid=(B, nq),
        in_specs=in_specs,
        out_specs=pl.BlockSpec((1, tq, D), lambda b, qi: (b, qi, 0)),
        scratch_shapes=[pltpu.VMEM((tq, D), jnp.float32)],
        compiler_params=pltpu.CompilerParams(
            dimension_semantics=("parallel", "parallel"),
            vmem_limit_bytes=64 * 1024 * 1024),
    )(*inputs)


def layer_norm(x, ln_ab, eps):
    """Standalone LayerNormalization (used only when there are no layers)."""
    B, S, D = x.shape
    kernel = functools.partial(_layernorm_kernel, eps=eps)
    return pl.pallas_call(
        kernel,
        out_shape=jax.ShapeDtypeStruct((B, S, D), jnp.float32),
        grid=(B,),
        in_specs=[
            pl.BlockSpec((1, S, D), lambda b: (b, 0, 0)),
            pl.BlockSpec(memory_space=pltpu.MemorySpace.SMEM),
        ],
        out_specs=pl.BlockSpec((1, S, D), lambda b: (b, 0, 0)),
        compiler_params=pltpu.CompilerParams(
            dimension_semantics=("parallel",)),
    )(x, ln_ab)


def encoder_forward(x, mask, prepared_layers, ln_ab, eps, num_heads, tq=None):
    """Pallas-backed Encoder.forward: layers, then LayerNorm (fused in last)."""
    del mask  # TODO(synk): mask is a no-op in the source (masked_fill discarded)
    n = len(prepared_layers)
    if n == 0:
        return layer_norm(x, ln_ab, eps)
    for i, p in enumerate(prepared_layers):
        fuse = (i == n - 1)
        x = mha_layer(x, p, num_heads,
                      ln_ab=ln_ab if fuse else None, eps=eps, tq=tq)
    return x


# ------------------------------- reference ----------------------------------

def _ref_mha_layer(x, p, h):
    B, S, D = x.shape
    d_k = D // h
    q = (x @ p["wq"] + p["bq"]).reshape(B, S, h, d_k).transpose(0, 2, 1, 3)
    k = (x @ p["wk"] + p["bk"]).reshape(B, S, h, d_k).transpose(0, 2, 1, 3)
    v = (x @ p["wv"] + p["bv"]).reshape(B, S, h, d_k).transpose(0, 2, 1, 3)
    scores = jnp.einsum("bhqd,bhkd->bhqk", q, k) / math.sqrt(d_k)
    probs = jax.nn.softmax(scores, axis=-1)
    o = jnp.einsum("bhqk,bhkd->bhqd", probs, v)
    o = o.transpose(0, 2, 1, 3).reshape(B, S, D)
    return o @ p["wo"] + p["bo"]


def ref_encoder(x, layer_params, alpha, bias, eps, h):
    for p in layer_params:
        x = _ref_mha_layer(x, p, h)
    mean = jnp.mean(x, axis=-1, keepdims=True)
    std = jnp.std(x, axis=-1, ddof=1, keepdims=True)   # torch .std() unbiased
    return alpha * (x - mean) / (std + eps) + bias


# --------------------------------- main --------------------------------------

if __name__ == "__main__":
    B, S, d_model, h, num_layers = 2, 16, 32, 4, 2
    eps = 1e-6

    key0 = jax.random.PRNGKey(0)
    keys = jax.random.split(key0, 1 + 8 * num_layers)

    x = jax.random.normal(keys[0], (B, S, d_model), jnp.float32)

    def init_linear(kw, kb, fan_in, fan_out):
        # deterministic stand-in for nn.Linear default init; weight stored as
        # (in, out), i.e. transposed relative to torch's (out, in)
        bound = 1.0 / math.sqrt(fan_in)
        w = jax.random.uniform(kw, (fan_in, fan_out), jnp.float32, -bound, bound)
        b = jax.random.uniform(kb, (fan_out,), jnp.float32, -bound, bound)
        return w, b

    layer_params = []
    for l in range(num_layers):
        ks = keys[1 + 8 * l:1 + 8 * (l + 1)]
        wq, bq = init_linear(ks[0], ks[1], d_model, d_model)
        wk, bk = init_linear(ks[2], ks[3], d_model, d_model)
        wv, bv = init_linear(ks[4], ks[5], d_model, d_model)
        wo, bo = init_linear(ks[6], ks[7], d_model, d_model)
        layer_params.append(dict(wq=wq, bq=bq, wk=wk, bk=bk,
                                 wv=wv, bv=bv, wo=wo, bo=bo))

    alpha = jnp.ones((1,), jnp.float32)   # LayerNormalization.alpha (ones)
    bias = jnp.ones((1,), jnp.float32)    # LayerNormalization.bias  (ones)
    ln_ab = jnp.concatenate([alpha, bias]).astype(jnp.float32)   # SMEM scalars

    prepared = prepare_encoder_params(layer_params, h)

    ref = ref_encoder(x, layer_params, alpha, bias, eps, h)

    # Path 1: fused single-QKV-matmul (tq == S).
    out_fused = encoder_forward(x, None, prepared, ln_ab, eps, h, tq=None)
    out_fused = jax.block_until_ready(out_fused)
    # Path 2: query-tiled grid (tq < S) — the v7x-friendly scaling path.
    out_tiled = encoder_forward(x, None, prepared, ln_ab, eps, h, tq=8)
    out_tiled = jax.block_until_ready(out_tiled)

    assert out_fused.shape == (B, S, d_model)
    assert out_tiled.shape == (B, S, d_model)
    # tolerance accounts for bf16 MXU operands (f32 accumulation)
    assert jnp.allclose(out_fused, ref, atol=3e-2, rtol=3e-2), "fused mismatch"
    assert jnp.allclose(out_tiled, ref, atol=3e-2, rtol=3e-2), "tiled mismatch"

    print("KERNEL_OK")
</pallas_src>

<mosaic_0001>
module attributes {stable_mosaic.version = 11 : i64} {
  func.func @_encoder_layer_kernel(%arg0: i32, %arg1: i32, %arg2: memref<1x16x32xf32, #tpu.memory_space<vmem>>, %arg3: memref<32x96xbf16, #tpu.memory_space<vmem>>, %arg4: memref<1x96xf32, #tpu.memory_space<vmem>>, %arg5: memref<32x32xbf16, #tpu.memory_space<vmem>>, %arg6: memref<1x32xf32, #tpu.memory_space<vmem>>, %arg7: memref<1x16x32xf32, #tpu.memory_space<vmem>>, %arg8: memref<16x32xf32, #tpu.memory_space<vmem>>) attributes {dimension_semantics = [#tpu.dimension_semantics<parallel>, #tpu.dimension_semantics<parallel>], iteration_bounds = array<i64: 2, 1>, scalar_prefetch = 0 : i64, scratch_operands = 1 : i64, tpu.core_type = #tpu.core_type<tc>, window_params = [{transform_indices = @transform_0, window_bounds = array<i64: 1, 16, 32>}, {pipeline_mode = #tpu.pipeline_mode<synchronous>, transform_indices = @transform_1, window_bounds = array<i64: 32, 96>}, {pipeline_mode = #tpu.pipeline_mode<synchronous>, transform_indices = @transform_2, window_bounds = array<i64: 1, 96>}, {pipeline_mode = #tpu.pipeline_mode<synchronous>, transform_indices = @transform_3, window_bounds = array<i64: 32, 32>}, {pipeline_mode = #tpu.pipeline_mode<synchronous>, transform_indices = @transform_4, window_bounds = array<i64: 1, 32>}, {transform_indices = @transform_5, window_bounds = array<i64: 1, 16, 32>}]} {
    %c0 = arith.constant 0 : index
    %c0_0 = arith.constant 0 : index
    %c0_1 = arith.constant 0 : index
    %0 = vector.load %arg2[%c0, %c0_0, %c0_1] : memref<1x16x32xf32, #tpu.memory_space<vmem>>, vector<1x16x32xf32>
    %1 = vector.shape_cast %0 : vector<1x16x32xf32> to vector<16x32xf32>
    %c0_2 = arith.constant 0 : index
    %c0_3 = arith.constant 0 : index
    %2 = vector.load %arg3[%c0_2, %c0_3] : memref<32x96xbf16, #tpu.memory_space<vmem>>, vector<32x96xbf16>
    %c0_4 = arith.constant 0 : index
    %c0_5 = arith.constant 0 : index
    %3 = vector.load %arg4[%c0_4, %c0_5] : memref<1x96xf32, #tpu.memory_space<vmem>>, vector<1x96xf32>
    %4 = arith.truncf %1 : vector<16x32xf32> to vector<16x32xbf16>
    %cst = arith.constant dense<0.000000e+00> : vector<16x96xf32>
    %5 = tpu.matmul %4, %2, %cst {dimension_numbers = #tpu.dot_dimension_numbers<[1], [0], [0], [1], [0, 0, 1, 1], [], []>} : vector<16x32xbf16>, vector<32x96xbf16>, vector<16x96xf32> -> vector<16x96xf32>
    %6 = vector.broadcast %3 : vector<1x96xf32> to vector<16x96xf32>
    %7 = arith.addf %5, %6 : vector<16x96xf32>
    %8 = vector.extract_strided_slice %7 {offsets = [0, 0], sizes = [16, 32], strides = [1, 1]} : vector<16x96xf32> to vector<16x32xf32>
    %9 = vector.extract_strided_slice %7 {offsets = [0, 32], sizes = [16, 32], strides = [1, 1]} : vector<16x96xf32> to vector<16x32xf32>
    %10 = vector.extract_strided_slice %7 {offsets = [0, 64], sizes = [16, 32], strides = [1, 1]} : vector<16x96xf32> to vector<16x32xf32>
    %11 = vector.extract_strided_slice %8 {offsets = [0, 0], sizes = [16, 8], strides = [1, 1]} : vector<16x32xf32> to vector<16x8xf32>
    %12 = arith.truncf %11 : vector<16x8xf32> to vector<16x8xbf16>
    %13 = vector.extract_strided_slice %9 {offsets = [0, 0], sizes = [16, 8], strides = [1, 1]} : vector<16x32xf32> to vector<16x8xf32>
    %14 = arith.truncf %13 : vector<16x8xf32> to vector<16x8xbf16>
    %15 = vector.extract_strided_slice %10 {offsets = [0, 0], sizes = [16, 8], strides = [1, 1]} : vector<16x32xf32> to vector<16x8xf32>
    %16 = arith.truncf %15 : vector<16x8xf32> to vector<16x8xbf16>
    %cst_6 = arith.constant dense<0.000000e+00> : vector<16x16xf32>
    %17 = tpu.matmul %12, %14, %cst_6 {dimension_numbers = #tpu.dot_dimension_numbers<[1], [1], [0], [0], [0, 0, 1, 0], [], []>} : vector<16x8xbf16>, vector<16x8xbf16>, vector<16x16xf32> -> vector<16x16xf32>
    %cst_7 = arith.constant dense<0xFF800000> : vector<16xf32>
    %18 = vector.multi_reduction <maximumf>, %17, %cst_7 [1] : vector<16x16xf32> to vector<16xf32>
    %19 = vector.shape_cast %18 : vector<16xf32> to vector<16x1xf32>
    %20 = vector.broadcast %19 : vector<16x1xf32> to vector<16x16xf32>
    %21 = arith.subf %17, %20 : vector<16x16xf32>
    %22 = math.exp %21 : vector<16x16xf32>
    %cst_8 = arith.constant dense<0.000000e+00> : vector<16xf32>
    %23 = vector.multi_reduction <add>, %22, %cst_8 [1] : vector<16x16xf32> to vector<16xf32>
    %24 = vector.shape_cast %23 : vector<16xf32> to vector<16x1xf32>
    %25 = tpu.reciprocal %24 : vector<16x1xf32> -> vector<16x1xf32>
    %26 = vector.broadcast %25 : vector<16x1xf32> to vector<16x16xf32>
    %27 = arith.mulf %22, %26 : vector<16x16xf32>
    %28 = arith.truncf %27 : vector<16x16xf32> to vector<16x16xbf16>
    %cst_9 = arith.constant dense<0.000000e+00> : vector<16x8xf32>
    %29 = tpu.matmul %28, %16, %cst_9 {dimension_numbers = #tpu.dot_dimension_numbers<[1], [0], [0], [1], [0, 0, 1, 1], [], []>} : vector<16x16xbf16>, vector<16x8xbf16>, vector<16x8xf32> -> vector<16x8xf32>
    %c0_10 = arith.constant 0 : index
    %c0_11 = arith.constant 0 : index
    %30 = vector.load %arg8[%c0_10, %c0_11] : memref<16x32xf32, #tpu.memory_space<vmem>>, vector<16x8xf32>
    tpu.vector_store %arg8[%c0_10, %c0_11], %29 {strides = array<i32>} : memref<16x32xf32, #tpu.memory_space<vmem>>, vector<16x8xf32>,
    %31 = vector.extract_strided_slice %8 {offsets = [0, 8], sizes = [16, 8], strides = [1, 1]} : vector<16x32xf32> to vector<16x8xf32>
    %32 = arith.truncf %31 : vector<16x8xf32> to vector<16x8xbf16>
    %33 = vector.extract_strided_slice %9 {offsets = [0, 8], sizes = [16, 8], strides = [1, 1]} : vector<16x32xf32> to vector<16x8xf32>
    %34 = arith.truncf %33 : vector<16x8xf32> to vector<16x8xbf16>
    %35 = vector.extract_strided_slice %10 {offsets = [0, 8], sizes = [16, 8], strides = [1, 1]} : vector<16x32xf32> to vector<16x8xf32>
    %36 = arith.truncf %35 : vector<16x8xf32> to vector<16x8xbf16>
    %cst_12 = arith.constant dense<0.000000e+00> : vector<16x16xf32>
    %37 = tpu.matmul %32, %34, %cst_12 {dimension_numbers = #tpu.dot_dimension_numbers<[1], [1], [0], [0], [0, 0, 1, 0], [], []>} : vector<16x8xbf16>, vector<16x8xbf16>, vector<16x16xf32> -> vector<16x16xf32>
    %cst_13 = arith.constant dense<0xFF800000> : vector<16xf32>
    %38 = vector.multi_reduction <maximumf>, %37, %cst_13 [1] : vector<16x16xf32> to vector<16xf32>
    %39 = vector.shape_cast %38 : vector<16xf32> to vector<16x1xf32>
    %40 = vector.broadcast %39 : vector<16x1xf32> to vector<16x16xf32>
    %41 = arith.subf %37, %40 : vector<16x16xf32>
    %42 = math.exp %41 : vector<16x16xf32>
    %cst_14 = arith.constant dense<0.000000e+00> : vector<16xf32>
    %43 = vector.multi_reduction <add>, %42, %cst_14 [1] : vector<16x16xf32> to vector<16xf32>
    %44 = vector.shape_cast %43 : vector<16xf32> to vector<16x1xf32>
    %45 = tpu.reciprocal %44 : vector<16x1xf32> -> vector<16x1xf32>
    %46 = vector.broadcast %45 : vector<16x1xf32> to vector<16x16xf32>
    %47 = arith.mulf %42, %46 : vector<16x16xf32>
    %48 = arith.truncf %47 : vector<16x16xf32> to vector<16x16xbf16>
    %cst_15 = arith.constant dense<0.000000e+00> : vector<16x8xf32>
    %49 = tpu.matmul %48, %36, %cst_15 {dimension_numbers = #tpu.dot_dimension_numbers<[1], [0], [0], [1], [0, 0, 1, 1], [], []>} : vector<16x16xbf16>, vector<16x8xbf16>, vector<16x8xf32> -> vector<16x8xf32>
    %c0_16 = arith.constant 0 : index
    %c8 = arith.constant 8 : index
    %50 = vector.load %arg8[%c0_16, %c8] : memref<16x32xf32, #tpu.memory_space<vmem>>, vector<16x8xf32>
    tpu.vector_store %arg8[%c0_16, %c8], %49 {strides = array<i32>} : memref<16x32xf32, #tpu.memory_space<vmem>>, vector<16x8xf32>,
    %51 = vector.extract_strided_slice %8 {offsets = [0, 16], sizes = [16, 8], strides = [1, 1]} : vector<16x32xf32> to vector<16x8xf32>
    %52 = arith.truncf %51 : vector<16x8xf32> to vector<16x8xbf16>
    %53 = vector.extract_strided_slice %9 {offsets = [0, 16], sizes = [16, 8], strides = [1, 1]} : vector<16x32xf32> to vector<16x8xf32>
    %54 = arith.truncf %53 : vector<16x8xf32> to vector<16x8xbf16>
    %55 = vector.extract_strided_slice %10 {offsets = [0, 16], sizes = [16, 8], strides = [1, 1]} : vector<16x32xf32> to vector<16x8xf32>
    %56 = arith.truncf %55 : vector<16x8xf32> to vector<16x8xbf16>
    %cst_17 = arith.constant dense<0.000000e+00> : vector<16x16xf32>
    %57 = tpu.matmul %52, %54, %cst_17 {dimension_numbers = #tpu.dot_dimension_numbers<[1], [1], [0], [0], [0, 0, 1, 0], [], []>} : vector<16x8xbf16>, vector<16x8xbf16>, vector<16x16xf32> -> vector<16x16xf32>
    %cst_18 = arith.constant dense<0xFF800000> : vector<16xf32>
    %58 = vector.multi_reduction <maximumf>, %57, %cst_18 [1] : vector<16x16xf32> to vector<16xf32>
    %59 = vector.shape_cast %58 : vector<16xf32> to vector<16x1xf32>
    %60 = vector.broadcast %59 : vector<16x1xf32> to vector<16x16xf32>
    %61 = arith.subf %57, %60 : vector<16x16xf32>
    %62 = math.exp %61 : vector<16x16xf32>
    %cst_19 = arith.constant dense<0.000000e+00> : vector<16xf32>
    %63 = vector.multi_reduction <add>, %62, %cst_19 [1] : vector<16x16xf32> to vector<16xf32>
    %64 = vector.shape_cast %63 : vector<16xf32> to vector<16x1xf32>
    %65 = tpu.reciprocal %64 : vector<16x1xf32> -> vector<16x1xf32>
    %66 = vector.broadcast %65 : vector<16x1xf32> to vector<16x16xf32>
    %67 = arith.mulf %62, %66 : vector<16x16xf32>
    %68 = arith.truncf %67 : vector<16x16xf32> to vector<16x16xbf16>
    %cst_20 = arith.constant dense<0.000000e+00> : vector<16x8xf32>
    %69 = tpu.matmul %68, %56, %cst_20 {dimension_numbers = #tpu.dot_dimension_numbers<[1], [0], [0], [1], [0, 0, 1, 1], [], []>} : vector<16x16xbf16>, vector<16x8xbf16>, vector<16x8xf32> -> vector<16x8xf32>
    %c0_21 = arith.constant 0 : index
    %c16 = arith.constant 16 : index
    %70 = vector.load %arg8[%c0_21, %c16] : memref<16x32xf32, #tpu.memory_space<vmem>>, vector<16x8xf32>
    tpu.vector_store %arg8[%c0_21, %c16], %69 {strides = array<i32>} : memref<16x32xf32, #tpu.memory_space<vmem>>, vector<16x8xf32>,
    %71 = vector.extract_strided_slice %8 {offsets = [0, 24], sizes = [16, 8], strides = [1, 1]} : vector<16x32xf32> to vector<16x8xf32>
    %72 = arith.truncf %71 : vector<16x8xf32> to vector<16x8xbf16>
    %73 = vector.extract_strided_slice %9 {offsets = [0, 24], sizes = [16, 8], strides = [1, 1]} : vector<16x32xf32> to vector<16x8xf32>
    %74 = arith.truncf %73 : vector<16x8xf32> to vector<16x8xbf16>
    %75 = vector.extract_strided_slice %10 {offsets = [0, 24], sizes = [16, 8], strides = [1, 1]} : vector<16x32xf32> to vector<16x8xf32>
    %76 = arith.truncf %75 : vector<16x8xf32> to vector<16x8xbf16>
    %cst_22 = arith.constant dense<0.000000e+00> : vector<16x16xf32>
    %77 = tpu.matmul %72, %74, %cst_22 {dimension_numbers = #tpu.dot_dimension_numbers<[1], [1], [0], [0], [0, 0, 1, 0], [], []>} : vector<16x8xbf16>, vector<16x8xbf16>, vector<16x16xf32> -> vector<16x16xf32>
    %cst_23 = arith.constant dense<0xFF800000> : vector<16xf32>
    %78 = vector.multi_reduction <maximumf>, %77, %cst_23 [1] : vector<16x16xf32> to vector<16xf32>
    %79 = vector.shape_cast %78 : vector<16xf32> to vector<16x1xf32>
    %80 = vector.broadcast %79 : vector<16x1xf32> to vector<16x16xf32>
    %81 = arith.subf %77, %80 : vector<16x16xf32>
    %82 = math.exp %81 : vector<16x16xf32>
    %cst_24 = arith.constant dense<0.000000e+00> : vector<16xf32>
    %83 = vector.multi_reduction <add>, %82, %cst_24 [1] : vector<16x16xf32> to vector<16xf32>
    %84 = vector.shape_cast %83 : vector<16xf32> to vector<16x1xf32>
    %85 = tpu.reciprocal %84 : vector<16x1xf32> -> vector<16x1xf32>
    %86 = vector.broadcast %85 : vector<16x1xf32> to vector<16x16xf32>
    %87 = arith.mulf %82, %86 : vector<16x16xf32>
    %88 = arith.truncf %87 : vector<16x16xf32> to vector<16x16xbf16>
    %cst_25 = arith.constant dense<0.000000e+00> : vector<16x8xf32>
    %89 = tpu.matmul %88, %76, %cst_25 {dimension_numbers = #tpu.dot_dimension_numbers<[1], [0], [0], [1], [0, 0, 1, 1], [], []>} : vector<16x16xbf16>, vector<16x8xbf16>, vector<16x8xf32> -> vector<16x8xf32>
    %c0_26 = arith.constant 0 : index
    %c24 = arith.constant 24 : index
    %90 = vector.load %arg8[%c0_26, %c24] : memref<16x32xf32, #tpu.memory_space<vmem>>, vector<16x8xf32>
    tpu.vector_store %arg8[%c0_26, %c24], %89 {strides = array<i32>} : memref<16x32xf32, #tpu.memory_space<vmem>>, vector<16x8xf32>,
    %c0_27 = arith.constant 0 : index
    %c0_28 = arith.constant 0 : index
    %91 = vector.load %arg8[%c0_27, %c0_28] : memref<16x32xf32, #tpu.memory_space<vmem>>, vector<16x32xf32>
    %92 = arith.truncf %91 : vector<16x32xf32> to vector<16x32xbf16>
    %c0_29 = arith.constant 0 : index
    %c0_30 = arith.constant 0 : index
    %93 = vector.load %arg5[%c0_29, %c0_30] : memref<32x32xbf16, #tpu.memory_space<vmem>>, vector<32x32xbf16>
    %cst_31 = arith.constant dense<0.000000e+00> : vector<16x32xf32>
    %94 = tpu.matmul %92, %93, %cst_31 {dimension_numbers = #tpu.dot_dimension_numbers<[1], [0], [0], [1], [0, 0, 1, 1], [], []>} : vector<16x32xbf16>, vector<32x32xbf16>, vector<16x32xf32> -> vector<16x32xf32>
    %c0_32 = arith.constant 0 : index
    %c0_33 = arith.constant 0 : index
    %95 = vector.load %arg6[%c0_32, %c0_33] : memref<1x32xf32, #tpu.memory_space<vmem>>, vector<1x32xf32>
    %96 = vector.broadcast %95 : vector<1x32xf32> to vector<16x32xf32>
    %97 = arith.addf %94, %96 : vector<16x32xf32>
    %c0_34 = arith.constant 0 : index
    %c0_35 = arith.constant 0 : index
    %c0_36 = arith.constant 0 : index
    %98 = vector.load %arg7[%c0_34, %c0_35, %c0_36] : memref<1x16x32xf32, #tpu.memory_space<vmem>>, vector<1x16x32xf32>
    %99 = vector.shape_cast %98 : vector<1x16x32xf32> to vector<16x32xf32>
    %100 = vector.shape_cast %97 : vector<16x32xf32> to vector<1x16x32xf32>
    tpu.vector_store %arg7[%c0_34, %c0_35, %c0_36], %100 {strides = array<i32>} : memref<1x16x32xf32, #tpu.memory_space<vmem>>, vector<1x16x32xf32>,
    return
  }
  func.func @transform_0(%arg0: i32, %arg1: i32) -> (i32, i32, i32) {
    %c0_i32 = arith.constant 0 : i32
    %c0_i32_0 = arith.constant 0 : i32
    return %arg0, %arg1, %c0_i32 : i32, i32, i32
  }
  func.func @transform_1(%arg0: i32, %arg1: i32) -> (i32, i32) {
    %c0_i32 = arith.constant 0 : i32
    %c0_i32_0 = arith.constant 0 : i32
    %c0_i32_1 = arith.constant 0 : i32
    return %c0_i32, %c0_i32_0 : i32, i32
  }
  func.func @transform_2(%arg0: i32, %arg1: i32) -> (i32, i32) {
    %c0_i32 = arith.constant 0 : i32
    %c0_i32_0 = arith.constant 0 : i32
    %c0_i32_1 = arith.constant 0 : i32
    return %c0_i32, %c0_i32_0 : i32, i32
  }
  func.func @transform_3(%arg0: i32, %arg1: i32) -> (i32, i32) {
    %c0_i32 = arith.constant 0 : i32
    %c0_i32_0 = arith.constant 0 : i32
    %c0_i32_1 = arith.constant 0 : i32
    return %c0_i32, %c0_i32_0 : i32, i32
  }
  func.func @transform_4(%arg0: i32, %arg1: i32) -> (i32, i32) {
    %c0_i32 = arith.constant 0 : i32
    %c0_i32_0 = arith.constant 0 : i32
    %c0_i32_1 = arith.constant 0 : i32
    return %c0_i32, %c0_i32_0 : i32, i32
  }
  func.func @transform_5(%arg0: i32, %arg1: i32) -> (i32, i32, i32) {
    %c0_i32 = arith.constant 0 : i32
    %c0_i32_0 = arith.constant 0 : i32
    return %arg0, %arg1, %c0_i32 : i32, i32, i32
  }
}

</mosaic_0001>

<bundles_post_ra>
// kernel: tpu_custom_call.1
= control target key start
LH: loop header
LB: loop body
LE: loop exit
PB: predicated region body
PF: predicated region fallthrough
CT: control target
= control target key end

     0   :  { %s1605_s0 = inlined_call_operand.hbm [shape: f32[2,16,32], index: 0, kind: input, shape index: {}]   ;;  %s1606_s1 = inlined_call_operand.hbm [shape: bf16[32,96], index: 1, kind: input, shape index: {}]   ;;  %s1607_s2 = inlined_call_operand.vmem [shape: f32[1,96], index: 2, kind: input, shape index: {}]   ;;  %s1608_s3 = inlined_call_operand.hbm [shape: bf16[32,32], index: 3, kind: input, shape index: {}]   ;;  %s1609_s4 = inlined_call_operand.vmem [shape: f32[1,32], index: 4, kind: input, shape index: {}]   ;;  %s1610_s5 = inlined_call_operand.hbm [shape: f32[2,16,32], index: 5, kind: output, shape index: {}]  }
   0x1   :  { %1612 = sst [smem:[#allocation14_spill]] %s1606_s1 }
   0x2   :  { %1613 = sst [smem:[#allocation15_spill]] %s1608_s3 }
   0x3   :  { %10 = vsyncpa [#allocation4], 0 }
   0x4   :  { %12 = vsyncpa [#allocation4 + $0x1], 0 }
   0x5   :  { %13 = vsyncpa [#allocation7], 0 }
   0x6   :  { %14 = vsyncpa [#allocation5], 0 }
   0x7   :  { %16 = vsyncpa [#allocation5 + $0x1], 0  ;;  %s1331_s18 = smov 0   ;;  %s1333_s19 = smov 0  }
   0x8   :  { %s1335_s20 = smov 0   ;;  %s1337_s21 = smov 0  }
   0x9   :  { %s1339_s22 = smov 0   ;;  %s1341_s23 = smov 0  }
   0xa LB: > { %s915_s24 = sadd.s32 4294967295, %s1278_s23   ;;  %s916_s25 = sadd.s32 4294967294, %s1278_s23   ;;  %s1278_s23 = sphi %s1341_s23, %s22_s23   ;;  %s1274_s22 = sphi %s1339_s22, %s1633_s22   ;;  %s1270_s21 = sphi %s1337_s21, %s1632_s21   ;;  %s1266_s20 = sphi %s1335_s20, %s1631_s20   ;;  %s1262_s19 = sphi %s1333_s19, %s1630_s19   ;;  %s1258_s18 = sphi %s1331_s18, %s1629_s18  }
   0xb   : > { %p56_p0 = scmp.ne.s32.totalorder %s1262_s19, %s1258_s18  ;;  %p1365_p1 = scmp.eq.s32.totalorder %s915_s24, 0 }
   0xc   : > { %p1369_p2 = scmp.eq.s32.totalorder %s915_s24, 1  ;;  %p172_p3 = scmp.eq.s32.totalorder %s916_s25, 1 }
   0xd   : > { %p1375_p4 = por %p1365_p1, %p56_p0  ;;  %p917_p5 = scmp.ge.s32.totalorder %s1278_s23, 1 }
   0xe   : > { %p1380_p6 = por %p172_p3, %p56_p0  ;;  %p179_p7 = scmp.lt.s32.totalorder %s1278_s23, 3 }
   0xf   : > { %s1618_s1 = sld [smem:[#allocation14_spill]]  ;;  %s1280_s9 = smov [#allocation6]  }
  0x10   : > { %p1388_p8 = pnand %p917_p5, %p179_p7  ;;  %s192_s10 = sshll.u32 %s1280_s9, 4  ;;  %s193_s10 = int_to_ptr.vmem [resolvable:$true] %s192_s10 }
  0x11   : > { %p920_p11 = scmp.ge.s32.totalorder %s1278_s23, 2  ;;  %s1620_s3 = sld [smem:[#allocation15_spill]] }
  0x12   : > { %p978_p9 = pneg %p1388_p8  ;;  %s1281_s14 = smov 64  }
  0x13   : > { %s1282_s15 = smov 4   ;;  %s1283_s16 = smov [#allocation8]  }
  0x14   : > { %p979_p10 = pnand %p978_p9, %p1365_p1  ;;  %s209_s17 = sshll.u32 %s1283_s16, 4  ;;  %s210_s17 = int_to_ptr.vmem [resolvable:$true] %s209_s17 }
  0x15   : > { %s190_s7 = sshll.u32 %s1618_s1, 4  ;;  %s34_s24 = sadd.s32 1, %s1274_s22  ;;  %s191_s7 = int_to_ptr.hbm [resolvable:$true] %s190_s7 }
  0x16   : > { %981 = dma.hbm_to_vmem [thread:$0]  (!%p979_p10), %s191_s7, 256, %s193_s10, [#allocation7], %s1281_s14, %s1281_s14, %s1282_s15  }
  0x17   : > { %s207_s13 = sshll.u32 %s1620_s3, 4  ;;  %s43_s25 = sadd.s32 1, %s1266_s20  ;;  %s208_s13 = int_to_ptr.hbm [resolvable:$true] %s207_s13 }
  0x18   : > { %984 = dma.hbm_to_vmem [thread:$0]  (!%p979_p10), %s208_s13, 256, %s210_s17, [#allocation7], %s1281_s14, %s1281_s14, %s1282_s15  }
  0x19   : > { %p36_p12 = scmp.ge.s32.totalorder %s34_s24, 2  ;;  %p50_p13 = scmp.ne.s32.totalorder %s1266_s20, %s1262_s19 }
  0x1a   : > { %p51_p0 = scmp.eq.s32.totalorder %s1278_s23, 0  ;;  %p995_p3 = scmp.lt.s32.totalorder %s1278_s23, 2 }
  0x1b   : > { %s1635_s24 = smov (%p36_p12, %s34_s24), 0  ;;  %p1414_p7 = por %p1369_p2, %p50_p13 }
  0x1c   : > { %1621 = sst [smem:[#allocation13_spill]] %s1635_s24  ;;  %p1408_p5 = por %p51_p0, %p50_p13 }
  0x1d   : > { %s38_s7 = ssub.s32 %s1274_s22, %s1635_s24  ;;  %s226_s9 = sand.u32 1, %s1266_s20  }
  0x1e   : > { %p41_p9 = scmp.eq.s32.totalorder %s38_s7, 0  ;;  %s921_s10 = sshll.u32 %s226_s9, 4 }
  0x1f   : > { %s960_s11 = sshll.u32 %s1274_s22, 4  ;;  %s230_s17 = scalar_lea.vmem [#allocation3], %s921_s10 }
  0x20   : > { %s1423_s12 = scalar_select %p41_p9, %s1266_s20, %s43_s25  }
  0x21   : > { %s237_s15 = scalar_lea.hbm %s1605_s0, %s960_s11  ;;  %s240_s1 = sshll.u32 %s230_s17, 4  ;;  %s241_s1 = int_to_ptr.vmem [resolvable:$true] %s240_s1 }
  0x22   : > { %s238_s16 = sshll.u32 %s237_s15, 4  ;;  %p986_p2 = pnand %p995_p3, %p1408_p5  ;;  %s239_s16 = int_to_ptr.hbm [resolvable:$true] %s238_s16 }
  0x23   : > { %s227_s27 = scalar_lea.sflag [#allocation4], %s226_s9  ;;  %s1284_s3 = smov 128  }
  0x24   : > { %s1285_s24 = smov 8   ;;  %252 = sbr.rel (%p1388_p8) target bundleno = 1200 (0x4b0), region = 40 }
  0x25   : > { %988 = dma.hbm_to_vmem [thread:$0]  (!%p986_p2), %s239_s16, 256, %s241_s1, %s227_s27, %s1284_s3, %s1284_s3, %s1285_s24  }
  0x26   : > { %s1435_s25 = sand.u32 (!%p1388_p8), 1, %s1262_s19  }
  0x27   : > { %s925_s7 = sshll.u32 (!%p1388_p8), %s1435_s25, 4  ;;  %s255_s10 = scalar_lea.sflag (!%p1388_p8), [#allocation4], %s1435_s25 }
  0x28   : > { %s258_s30 = scalar_lea.vmem (!%p1388_p8), [#allocation3], %s925_s7 }
  0x29   : > { %1245 = dma.done.wait (%p1375_p4), %s255_s10, 256  }
  0x2a   : > { %1247 = vsyncadd (%p1375_p4), %s255_s10, 4294967040 }
  0x2b   : > { %1249 = dma.done.wait (%p1365_p1), [#allocation7], 512  }
  0x2c   : > { %1251 = vsyncadd (%p1365_p1), [#allocation7], 4294966784  ;;  %v962_v0 = vld [vmem:[#allocation6 + $0x8] sm:$0xff]  ;;  %v961_v1 = vld [vmem:[#allocation6] sm:$0xff]  ;;  %vm322_vm0 = vcmask 261120   ;;  %s1286_s26 = smov 104  }
  0x2d   : > { %332 = vmatpush.bf16.msra.mxu0 %v962_v0  ;;  %v299_v2 = vld [vmem:[%s258_s30] sm:$0xff]  ;;  %v300_v3 = vld [vmem:[%s258_s30 + $0x8] sm:$0xff]  ;;  %s1287_s28 = smov 120   ;;  %s1288_s8 = smov 96   ;;  %vm344_vm1 = vcmask 64512   ;;  %vm365_vm2 = vcmask 130048  }
  0x2e   : > { %v306_v4 = vpack.c.bf16 %v300_v3, %v299_v2  ;;  %v1068_v6 = vld [vmem:[%s1607_s2] ss:$0 sm:$0xff]  ;;  %s1289_s24 = smov 80   ;;  %s1290_s9 = smov 72  }
  0x2f   : > { %s1291_s11 = smov 88   ;;  %s1292_s13 = smov 112  }
  0x30   : > { %s1293_s14 = smov 64   ;;  %s1294_s15 = smov 56  }
  0x31   : > { %333 = vmatpush.bf16.msra.mxu0 %v961_v1  ;;  %s1295_s16 = smov 40   ;;  %s1296_s17 = smov 48  }
  0x32   : > { %s1297_s27 = smov 8   ;;  %s1298_s10 = smov 16  }
  0x33   : > { %s1299_s30 = smov 24  }
  0x34   : > { %937 = vmatmul.msk.bf16.vlgmr.msra.gmra.mxu0 %vm322_vm0, %v306_v4 }
  0xb1   : > { %v335_v5 = vpop.f32.mrf.mxu0 }
  0xb2   : > { %v336_v8 = vadd.f32 %v1068_v6, %v335_v5 }
  0xb9   : > { %v337_v7 = vpop.f32.mrf.mxu0 }
  0xba   : > { %v338_v9 = vadd.f32 %v1068_v6, %v337_v7 }
  0xbc   : > { %v1453_v10 = vpack.c.bf16 %v338_v9, %v336_v8 }
  0xbe   : > { %645 = vrot.lane.b32.xlu2 %v1453_v10, %s1286_s26  ;;  %437 = vrot.lane.b32.xlu1 %v1453_v10, %s1287_s28  ;;  %s965_s26 = sshll.u32 %s1270_s21, 4  ;;  %s295_s28 = scalar_lea.vmem [#allocation9], %s925_s7 }
  0xbf   : > { %342 = vrot.lane.b32.xlu0 %v1453_v10, %s1288_s8 }
  0xc6   : > { %543 = vrot.lane.b32.xlu2 %v1453_v10, %s1289_s24  ;;  %647 = vrot.lane.b32.xlu1 %v1453_v10, %s1290_s9  ;;  %s805_s9 = scalar_lea.hbm %s1610_s5, %s965_s26 }
  0xc7   : > { %439 = vrot.lane.b32.xlu0 %v1453_v10, %s1291_s11  ;;  %s806_s11 = sshll.u32 %s295_s28, 4  ;;  %s807_s11 = int_to_ptr.vmem [resolvable:$true] %s806_s11 }
  0xcf   : > { %541 = vrot.lane.b32.xlu0 %v1453_v10, %s1292_s13  ;;  %s808_s13 = sshll.u32 %s805_s9, 4  ;;  %s809_s13 = int_to_ptr.hbm [resolvable:$true] %s808_s13 }
  0xd0   : > { %s1206_s21 = sshra.s32 %s809_s13, 4  ;;  %s1207_s21 = int_to_ptr.hbm [resolvable:$true] %s1206_s21 }
  0xd1   : > { %p1213_p10 = scmp.lt.s32.totalorder %s1207_s21, %s1610_s5 }
 0x118   : > { %v646_v11 = vpop.permute.xlu2 %645 }
 0x120   : > { %v544_v12 = vpop.permute.xlu2 %543 }
 0x121   : > { %v549_v13 = vsel %vm344_vm1, %v544_v12, 0 }
 0x122   : > { %558 = vmatpush.bf16.xpose.msrb.mxu0 %v549_v13 }
 0x130   : > { %v438_v14 = vpop.permute.xlu1 %437 }
 0x131   : > { %v343_v15 = vpop.permute.xlu0 %342 }
 0x132   : > { %v349_v16 = vsel %vm344_vm1, %v343_v15, 0 }
 0x133   : > { %358 = vmatpush.bf16.xpose.msra.mxu1 %v349_v16 }
 0x138   : > { %v648_v17 = vpop.permute.xlu1 %647 }
 0x139   : > { %v440_v18 = vpop.permute.xlu0 %439  ;;  %v653_v19 = vsel %vm344_vm1, %v648_v17, 0 }
 0x13a   : > { %938 = vmatmul.msk.bf16.vlgmr.msra.gmra.mxu1 %vm344_vm1, %v1453_v10  ;;  %v445_v20 = vsel %vm344_vm1, %v440_v18, 0 }
 0x13b   : > { %454 = vmatpush.bf16.xpose.msra.mxu3 %v445_v20 }
 0x141   : > { %v542_v21 = vpop.permute.xlu0 %541 }
 0x142   : > { %940 = vmatmul.msk.bf16.vlgmr.msra.gmra.mxu3 %vm344_vm1, %v438_v14  ;;  %942 = vmatmul.msk.bf16.vlgmr.msrb.gmra.mxu0 %vm344_vm1, %v542_v21 }
 0x143   : > { %662 = vmatpush.bf16.xpose.msrb.mxu3 %v653_v19 }
 0x152   : > { %944 = vmatmul.msk.bf16.vlgmr.msrb.gmra.mxu3 %vm344_vm1, %v646_v11 }
 0x1b7   : > { %v360_v22 = vpop.f32.mrf.mxu1 }
 0x1b8   : > { %v366_v23 = vsel %vm365_vm2, %v360_v22, -inf }
 0x1b9   : > { %367 = vmax.xlane.f32.xlu1 %v366_v23 }
 0x1bf   : > { %v362_v24 = vpop.f32.mrf.mxu1  ;;  %v560_v25 = vpop.f32.mrf.mxu0 }
 0x1c0   : > { %v369_v26 = vsel %vm365_vm2, %v362_v24, -inf  ;;  %v565_v33 = vsel %vm365_vm2, %v560_v25, -inf }
 0x1c1   : > { %370 = vmax.xlane.f32.xlu2 %v369_v26 }
 0x1c5   : > { %v456_v27 = vpop.f32.mrf.mxu3 }
 0x1c6   : > { %v461_v28 = vsel %vm365_vm2, %v456_v27, -inf }
 0x1c7   : > { %462 = vmax.xlane.f32.xlu0 %v461_v28  ;;  %v562_v29 = vpop.f32.mrf.mxu0 }
 0x1c8   : > { %v568_v30 = vsel %vm365_vm2, %v562_v29, -inf }
 0x1c9   : > { %569 = vmax.xlane.f32.xlu1 %v568_v30 }
 0x1cd   : > { %v458_v31 = vpop.f32.mrf.mxu3 }
 0x1ce   : > { %v464_v32 = vsel %vm365_vm2, %v458_v31, -inf }
 0x1cf   : > { %465 = vmax.xlane.f32.xlu2 %v464_v32  ;;  %566 = vmax.xlane.f32.xlu0 %v565_v33 }
 0x1d5   : > { %v664_v34 = vpop.f32.mrf.mxu3 }
 0x1d6   : > { %v669_v35 = vsel %vm365_vm2, %v664_v34, -inf }
 0x1d7   : > { %670 = vmax.xlane.f32.xlu1 %v669_v35 }
 0x1dd   : > { %v666_v36 = vpop.f32.mrf.mxu3 }
 0x1de   : > { %v672_v37 = vsel %vm365_vm2, %v666_v36, -inf }
 0x1df   : > { %673 = vmax.xlane.f32.xlu2 %v672_v37 }
 0x22c   : > { %v368_v38 = vpop.xlane.xlu1 %367 }
 0x22d   : > { %v372_v39 = vsub.f32 %v360_v22, %v368_v38 }
 0x22f   : > { %v374_v40 = vmul.f32 1.442695, %v372_v39 }
 0x231   : > { %1070 = vpow2.f32 %v374_v40 }
 0x234   : > { %v371_v41 = vpop.xlane.xlu2 %370 }
 0x235   : > { %v373_v42 = vsub.f32 %v362_v24, %v371_v41 }
 0x237   : > { %v1479_v43 = vpop.eup %1070  ;;  %v376_v44 = vmul.f32 1.442695, %v373_v42 }
 0x238   : > { %v378_v45 = vsel %vm365_vm2, %v1479_v43, 0.0 }
 0x239   : > { %1072 = vpow2.f32 %v376_v44  ;;  %379 = vadd.xlane.f32.xlu2 %v378_v45 }
 0x23a   : > { %v463_v46 = vpop.xlane.xlu0 %462 }
 0x23b   : > { %v467_v47 = vsub.f32 %v456_v27, %v463_v46 }
 0x23c   : > { %v570_v4 = vpop.xlane.xlu1 %569 }
 0x23d   : > { %v469_v48 = vmul.f32 1.442695, %v467_v47  ;;  %v572_v5 = vsub.f32 %v562_v29, %v570_v4 }
 0x23f   : > { %v1483_v49 = vpop.eup %1072  ;;  %1074 = vpow2.f32 %v469_v48  ;;  %v575_v6 = vmul.f32 1.442695, %v572_v5 }
 0x240   : > { %v381_v50 = vsel %vm365_vm2, %v1483_v49, 0.0 }
 0x241   : > { %382 = vadd.xlane.f32.xlu0 %v381_v50 }
 0x242   : > { %v567_v51 = vpop.xlane.xlu0 %566  ;;  %v466_v52 = vpop.xlane.xlu2 %465 }
 0x243   : > { %v571_v53 = vsub.f32 %v560_v25, %v567_v51  ;;  %v468_v56 = vsub.f32 %v458_v31, %v466_v52 }
 0x245   : > { %v1487_v54 = vpop.eup %1074  ;;  %v573_v55 = vmul.f32 1.442695, %v571_v53  ;;  %v471_v58 = vmul.f32 1.442695, %v468_v56 }
 0x246   : > { %v473_v57 = vsel %vm365_vm2, %v1487_v54, 0.0 }
 0x247   : > { %474 = vadd.xlane.f32.xlu1 %v473_v57  ;;  %1076 = vpow2.f32 %v573_v55 }
 0x248   : > { %1078 = vpow2.f32 %v471_v58 }
 0x24a   : > { %v671_v7 = vpop.xlane.xlu1 %670 }
 0x24b   : > { %v675_v8 = vsub.f32 %v664_v34, %v671_v7 }
 0x24d   : > { %v1491_v59 = vpop.eup %1076  ;;  %v677_v11 = vmul.f32 1.442695, %v675_v8 }
 0x24e   : > { %v577_v60 = vsel %vm365_vm2, %v1491_v59, 0.0  ;;  %v1495_v63 = vpop.eup %1078 }
 0x24f   : > { %578 = vadd.xlane.f32.xlu2 %v577_v60  ;;  %v476_v1 = vsel %vm365_vm2, %v1495_v63, 0.0 }
 0x252   : > { %v674_v61 = vpop.xlane.xlu2 %673 }
 0x253   : > { %v676_v62 = vsub.f32 %v666_v36, %v674_v61 }
 0x255   : > { %v679_v0 = vmul.f32 1.442695, %v676_v62  ;;  %415 = vrot.lane.b32.xlu0 %v1453_v10, %s1293_s14  ;;  %s792_s14 = scalar_lea.sflag [#allocation5], %s1435_s25 }
 0x257   : > { %1080 = vpow2.f32 %v679_v0  ;;  %477 = vadd.xlane.f32.xlu2 %v476_v1 }
 0x258   : > { %1082 = vpow2.f32 %v575_v6 }
 0x259   : > { %1084 = vpow2.f32 %v677_v11 }
 0x25d   : > { %v1500_v2 = vpop.eup %1080 }
 0x25e   : > { %v684_v3 = vsel %vm365_vm2, %v1500_v2, 0.0  ;;  %v1506_v9 = vpop.eup %1082 }
 0x25f   : > { %685 = vadd.xlane.f32.xlu2 %v684_v3  ;;  %v580_v12 = vsel %vm365_vm2, %v1506_v9, 0.0  ;;  %v1510_v13 = vpop.eup %1084 }
 0x260   : > { %510 = vrot.lane.b32.xlu1 %v1453_v10, %s1294_s15  ;;  %v681_v14 = vsel %vm365_vm2, %v1510_v13, 0.0  ;;  %s1208_s15 = scalar_lea.hbm %s1207_s21, 16 }
 0x261   : > { %p1209_p1 = scmp.ne.s32.totalorder %s1207_s21, %s1208_s15 }
 0x263   : > { %p1210_p4 = pnand %p1209_p1, %p1414_p7 }
 0x265   : > { %p1211_p8 = pneg %p1210_p4 }
 0x277   : > { %718 = vrot.lane.b32.xlu2 %v1453_v10, %s1295_s16 }
 0x27f   : > { %581 = vadd.xlane.f32.xlu0 %v580_v12 }
 0x28a   : > { %682 = vadd.xlane.f32.xlu1 %v681_v14 }
 0x2a3   : > { %614 = vrot.lane.b32.xlu1 %v1453_v10, %s1296_s17  ;;  %s1212_s17 = scalar_lea.hbm %s1610_s5, 32 }
 0x2a4   : > { %p1214_p12 = scmp.lt.s32.totalorder %s1212_s17, %s1208_s15 }
 0x2a6   : > { %p1215_p13 = por %p1214_p12, %p1213_p10 }
 0x2a8   : > { %p1216_p0 = pnand %p1215_p13, %p1211_p8 }
 0x2ac   : > { %v380_v15 = vpop.xlane.xlu2 %379 }
 0x2ad   : > { %1086 = vrcp.f32 %v380_v15  ;;  %v395_v25 = vand.u32 2147483648, %v380_v15  ;;  %vm389_vm4 = vweird.f32 %v380_v15  ;;  %v393_v27 = vand.u32 2147483647, %v380_v15 }
 0x2af   : > { %v396_v31 = vor.u32 1.1754944e-38, %v395_v25  ;;  %vm394_vm7 = vcmp.eq.f32.partialorder %v393_v27, 8.507059e+37 }
 0x2b3   : > { %v1087_v16 = vpop.eup %1086 }
 0x2b4   : > { %v385_v17 = vmul.f32 %v1087_v16, %v380_v15  ;;  %v383_v18 = vpop.xlane.xlu0 %382  ;;  %vm390_vm3 = vweird.f32 %v1087_v16 }
 0x2b5   : > { %1088 = vrcp.f32 %v383_v18  ;;  %vm391_vm5 = vmor %vm389_vm4, %vm390_vm3  ;;  %v409_v28 = vand.u32 2147483648, %v383_v18  ;;  %v407_v29 = vand.u32 2147483647, %v383_v18  ;;  %vm403_vm8 = vweird.f32 %v383_v18 }
 0x2b6   : > { %v386_v19 = vsub.f32 1.0, %v385_v17 }
 0x2b7   : > { %v410_v35 = vor.u32 1.1754944e-38, %v409_v28  ;;  %vm408_vm10 = vcmp.eq.f32.partialorder %v407_v29, 8.507059e+37 }
 0x2b8   : > { %v387_v20 = vmul.f32 %v1087_v16, %v386_v19 }
 0x2ba   : > { %v475_v22 = vpop.xlane.xlu1 %474  ;;  %v388_v24 = vadd.f32 %v1087_v16, %v387_v20 }
 0x2bb   : > { %v1089_v21 = vpop.eup %1088  ;;  %1090 = vrcp.f32 %v475_v22  ;;  %v490_v55 = vand.u32 2147483648, %v475_v22  ;;  %vm484_vm12 = vweird.f32 %v475_v22 }
 0x2bc   : > { %v399_v23 = vmul.f32 %v1089_v21, %v383_v18  ;;  %vm404_vm6 = vweird.f32 %v1089_v21  ;;  %v392_v30 = vsel %vm391_vm5, %v1087_v16, %v388_v24 }
 0x2bd   : > { %vm405_vm9 = vmor %vm403_vm8, %vm404_vm6  ;;  %v397_v36 = vsel %vm394_vm7, %v396_v31, %v392_v30  ;;  %v491_v61 = vor.u32 1.1754944e-38, %v490_v55 }
 0x2be   : > { %v400_v26 = vsub.f32 1.0, %v399_v23  ;;  %v412_v41 = vmul.f32 %v1479_v43, %v397_v36  ;;  %v488_v43 = vand.u32 2147483647, %v475_v22 }
 0x2c0   : > { %v401_v10 = vmul.f32 %v1089_v21, %v400_v26  ;;  %vm489_vm15 = vcmp.eq.f32.partialorder %v488_v43, 8.507059e+37 }
 0x2c1   : > { %v1091_v34 = vpop.eup %1090 }
 0x2c2   : > { %v402_v32 = vadd.f32 %v1089_v21, %v401_v10  ;;  %v1515_v33 = vpop.xlane.xlu2 %578  ;;  %v480_v39 = vmul.f32 %v1091_v34, %v475_v22  ;;  %vm485_vm11 = vweird.f32 %v1091_v34 }
 0x2c3   : > { %vm486_vm13 = vmor %vm484_vm12, %vm485_vm11 }
 0x2c4   : > { %v406_v37 = vsel %vm405_vm9, %v1089_v21, %v402_v32  ;;  %v481_v45 = vsub.f32 1.0, %v480_v39 }
 0x2c5   : > { %v411_v38 = vsel %vm408_vm10, %v410_v35, %v406_v37 }
 0x2c6   : > { %v413_v42 = vmul.f32 %v1483_v49, %v411_v38  ;;  %v482_v47 = vmul.f32 %v1091_v34, %v481_v45 }
 0x2c7   : > { %v416_v40 = vpop.permute.xlu0 %415 }
 0x2c8   : > { %428 = vmatpush.bf16.msra.mxu2 %v416_v40  ;;  %v414_v44 = vpack.c.bf16 %v413_v42, %v412_v41  ;;  %v483_v51 = vadd.f32 %v1091_v34, %v482_v47  ;;  %v594_v42 = vand.u32 2147483648, %v1515_v33 }
 0x2ca   : > { %v478_v46 = vpop.xlane.xlu2 %477  ;;  %v487_v57 = vsel %vm486_vm13, %v1091_v34, %v483_v51  ;;  %v595_v43 = vor.u32 1.1754944e-38, %v594_v42 }
 0x2cb   : > { %939 = vmatmul.msk.bf16.vlgmr.msra.gmra.mxu2 %vm365_vm2, %v414_v44  ;;  %1092 = vrcp.f32 %v478_v46  ;;  %v504_v56 = vand.u32 2147483648, %v478_v46  ;;  %v502_v60 = vand.u32 2147483647, %v478_v46  ;;  %vm498_vm3 = vweird.f32 %v478_v46 }
 0x2cc   : > { %v492_v1 = vsel %vm489_vm15, %v491_v61, %v487_v57 }
 0x2cd   : > { %v505_v0 = vor.u32 1.1754944e-38, %v504_v56  ;;  %vm503_vm5 = vcmp.eq.f32.partialorder %v502_v60, 8.507059e+37  ;;  %v507_v6 = vmul.f32 %v1487_v54, %v492_v1 }
 0x2d1   : > { %v1093_v48 = vpop.eup %1092 }
 0x2d2   : > { %v511_v50 = vpop.permute.xlu1 %510  ;;  %v494_v52 = vmul.f32 %v1093_v48, %v478_v46  ;;  %v1520_v53 = vpop.xlane.xlu2 %685  ;;  %vm499_vm14 = vweird.f32 %v1093_v48  ;;  %v592_v46 = vand.u32 2147483647, %v1515_v33 }
 0x2d3   : > { %523 = vmatpush.bf16.msrb.mxu2 %v511_v50  ;;  %vm500_vm4 = vmor %vm498_vm3, %vm499_vm14  ;;  %1094 = vrcp.f32 %v1520_v53  ;;  %vm706_vm7 = vweird.f32 %v1520_v53  ;;  %v712_v27 = vand.u32 2147483648, %v1520_v53  ;;  %v710_v28 = vand.u32 2147483647, %v1520_v53 }
 0x2d4   : > { %v495_v49 = vsub.f32 1.0, %v494_v52  ;;  %vm588_vm3 = vweird.f32 %v1515_v33 }
 0x2d5   : > { %v713_v37 = vor.u32 1.1754944e-38, %v712_v27  ;;  %vm711_vm13 = vcmp.eq.f32.partialorder %v710_v28, 8.507059e+37 }
 0x2d6   : > { %v496_v58 = vmul.f32 %v1093_v48, %v495_v49 }
 0x2d8   : > { %v497_v62 = vadd.f32 %v1093_v48, %v496_v58 }
 0x2d9   : > { %v1095_v12 = vpop.eup %1094 }
 0x2da   : > { %v501_v3 = vsel %vm500_vm4, %v1093_v48, %v497_v62  ;;  %v719_v4 = vpop.permute.xlu2 %718  ;;  %v702_v14 = vmul.f32 %v1095_v12, %v1520_v53  ;;  %vm707_vm6 = vweird.f32 %v1095_v12 }
 0x2db   : > { %731 = vmatpush.bf16.msra.mxu2 %v719_v4  ;;  %v506_v5 = vsel %vm503_vm5, %v505_v0, %v501_v3  ;;  %vm1531_vm8 = vmor %vm706_vm7, %vm707_vm6 }
 0x2dc   : > { %v508_v7 = vmul.f32 %v1495_v63, %v506_v5  ;;  %v703_v17 = vsub.f32 1.0, %v702_v14 }
 0x2de   : > { %v509_v8 = vpack.c.bf16 %v508_v7, %v507_v6  ;;  %v704_v63 = vmul.f32 %v1095_v12, %v703_v17  ;;  %v964_v6 = vld [vmem:[#allocation8 + $0x8] sm:$0xff]  ;;  %v963_v7 = vld [vmem:[#allocation8] sm:$0xff] }
 0x2df   : > { %781 = vmatpush.bf16.msra.mxu0 %v964_v6 }
 0x2e0   : > { %941 = vmatmul.msk.bf16.vlgmr.msrb.gmra.mxu2 %vm365_vm2, %v509_v8  ;;  %v705_v23 = vadd.f32 %v1095_v12, %v704_v63 }
 0x2e2   : > { %v709_v30 = vsel %vm1531_vm8, %v1095_v12, %v705_v23  ;;  %vm593_vm8 = vcmp.eq.f32.partialorder %v592_v46, 8.507059e+37 }
 0x2e3   : > { %v714_v44 = vsel %vm711_vm13, %v713_v37, %v709_v30  ;;  %782 = vmatpush.bf16.msra.mxu0 %v963_v7 }
 0x2e4   : > { %v716_v53 = vmul.f32 %v1500_v2, %v714_v44 }
 0x2f2   : > { %v582_v11 = vpop.xlane.xlu0 %581 }
 0x2f3   : > { %1096 = vrcp.f32 %v582_v11  ;;  %vm602_vm12 = vweird.f32 %v582_v11  ;;  %v608_v38 = vand.u32 2147483648, %v582_v11  ;;  %v606_v40 = vand.u32 2147483647, %v582_v11 }
 0x2f4   : > { %1098 = vrcp.f32 %v1515_v33 }
 0x2f5   : > { %v609_v50 = vor.u32 1.1754944e-38, %v608_v38  ;;  %vm607_vm7 = vcmp.eq.f32.partialorder %v606_v40, 8.507059e+37 }
 0x2f9   : > { %v1097_v15 = vpop.eup %1096 }
 0x2fa   : > { %v1099_v16 = vpop.eup %1098  ;;  %v598_v18 = vmul.f32 %v1097_v15, %v582_v11  ;;  %vm603_vm10 = vweird.f32 %v1097_v15 }
 0x2fb   : > { %v584_v54 = vmul.f32 %v1099_v16, %v1515_v33  ;;  %vm589_vm9 = vweird.f32 %v1099_v16  ;;  %vm1538_vm14 = vmor %vm602_vm12, %vm603_vm10 }
 0x2fc   : > { %v599_v20 = vsub.f32 1.0, %v598_v18  ;;  %vm590_vm6 = vmor %vm588_vm3, %vm589_vm9  ;;  %vm746_vm9 = vcmask 261312   ;;  %v1069_v18 = vld [vmem:[%s1609_s4] ss:$0 sm:$0xff] }
 0x2fd   : > { %v683_v19 = vpop.xlane.xlu1 %682  ;;  %v585_v21 = vsub.f32 1.0, %v584_v54 }
 0x2fe   : > { %1100 = vrcp.f32 %v683_v19  ;;  %v600_v24 = vmul.f32 %v1097_v15, %v599_v20  ;;  %v698_v31 = vand.u32 2147483648, %v683_v19  ;;  %v696_v35 = vand.u32 2147483647, %v683_v19 }
 0x2ff   : > { %v586_v26 = vmul.f32 %v1099_v16, %v585_v21  ;;  %vm692_vm15 = vweird.f32 %v683_v19 }
 0x300   : > { %v601_v32 = vadd.f32 %v1097_v15, %v600_v24  ;;  %v699_v45 = vor.u32 1.1754944e-38, %v698_v31  ;;  %vm697_vm5 = vcmp.eq.f32.partialorder %v696_v35, 8.507059e+37 }
 0x301   : > { %v587_v36 = vadd.f32 %v1099_v16, %v586_v26 }
 0x302   : > { %v605_v47 = vsel %vm1538_vm14, %v1097_v15, %v601_v32 }
 0x303   : > { %v591_v52 = vsel %vm590_vm6, %v1099_v16, %v587_v36  ;;  %v610_v49 = vsel %vm607_vm7, %v609_v50, %v605_v47 }
 0x304   : > { %v1101_v22 = vpop.eup %1100  ;;  %v596_v33 = vsel %vm593_vm8, %v595_v43, %v591_v52  ;;  %v612_v57 = vmul.f32 %v1506_v9, %v610_v49 }
 0x305   : > { %v688_v25 = vmul.f32 %v1101_v22, %v683_v19  ;;  %vm693_vm11 = vweird.f32 %v1101_v22  ;;  %v611_v60 = vmul.f32 %v1491_v59, %v596_v33 }
 0x306   : > { %vm694_vm4 = vmor %vm692_vm15, %vm693_vm11 }
 0x307   : > { %v689_v29 = vsub.f32 1.0, %v688_v25  ;;  %v613_v61 = vpack.c.bf16 %v612_v57, %v611_v60 }
 0x309   : > { %v690_v34 = vmul.f32 %v1101_v22, %v689_v29 }
 0x30b   : > { %v691_v41 = vadd.f32 %v1101_v22, %v690_v34 }
 0x30d   : > { %v695_v48 = vsel %vm694_vm4, %v1101_v22, %v691_v41 }
 0x30e   : > { %v700_v51 = vsel %vm697_vm5, %v699_v45, %v695_v48 }
 0x30f   : > { %v715_v55 = vmul.f32 %v1510_v13, %v700_v51 }
 0x311   : > { %v717_v56 = vpack.c.bf16 %v716_v53, %v715_v55 }
 0x313   : > { %945 = vmatmul.msk.bf16.vlgmr.msra.gmra.mxu2 %vm365_vm2, %v717_v56 }
 0x315   : > { %v615_v58 = vpop.permute.xlu1 %614 }
 0x316   : > { %627 = vmatpush.bf16.msrb.mxu1 %v615_v58 }
 0x319   : > { %943 = vmatmul.msk.bf16.vlgmr.msrb.gmra.mxu1 %vm365_vm2, %v613_v61  ;;  %vm538_vm2 = vcmask 130112  }
 0x34e   : > { %v430_v2 = vpop.f32.mrf.mxu2 }
 0x34f   : > { %435 = vst.msk [vmem:[#allocation2] sm:$0xff] %vm344_vm1, %v430_v2 }
 0x356   : > { %v432_v13 = vpop.f32.mrf.mxu2 }
 0x357   : > { %436 = vst.msk [vmem:[#allocation2 + $0x8] sm:$0xff] %vm344_vm1, %v432_v13  ;;  %vm642_vm1 = vcmask 195712  }
 0x363   : > { %v525_v62 = vpop.f32.mrf.mxu2 }
 0x36b   : > { %v527_v0 = vpop.f32.mrf.mxu2 }
 0x36c   : > { %534 = vrot.lane.b32.xlu2 %v527_v0, %s1297_s27 }
 0x396   : > { %v629_v1 = vpop.f32.mrf.mxu1  ;;  %v733_v9 = vpop.f32.mrf.mxu2 }
 0x397   : > { %636 = vrot.lane.b32.xlu1 %v629_v1, %s1298_s10 }
 0x39e   : > { %v631_v59 = vpop.f32.mrf.mxu1  ;;  %v735_v3 = vpop.f32.mrf.mxu2 }
 0x39f   : > { %742 = vrot.lane.b32.xlu0 %v735_v3, %s1299_s30  ;;  %532 = vrot.lane.b32.xlu1 %v525_v62, %s1297_s27 }
 0x3a0   : > { %638 = vrot.lane.b32.xlu2 %v631_v59, %s1298_s10 }
 0x3a7   : > { %740 = vrot.lane.b32.xlu1 %v733_v9, %s1299_s30 }
 0x3c6   : > { %v535_v4 = vpop.permute.xlu2 %534 }
 0x3c7   : > { %540 = vst.msk [vmem:[#allocation2 + $0x8] sm:$0xff] %vm538_vm2, %v535_v4 }
 0x3fa   : > { %v639_v5 = vpop.permute.xlu2 %638 }
 0x3fb   : > { %644 = vst.msk [vmem:[#allocation2 + $0x8] sm:$0xff] %vm642_vm1, %v639_v5 }
 0x409   : > { %v637_v8 = vpop.permute.xlu1 %636 }
 0x411   : > { %v533_v11 = vpop.permute.xlu1 %532  ;;  %v743_v12 = vpop.permute.xlu0 %742 }
 0x412   : > { %539 = vst.msk [vmem:[#allocation2] sm:$0xff] %vm538_vm2, %v533_v11 }
 0x413   : > { %643 = vst.msk [vmem:[#allocation2] sm:$0xff] %vm642_vm1, %v637_v8 }
 0x414   : > { %748 = vst.msk [vmem:[#allocation2 + $0x8] sm:$0xff] %vm746_vm9, %v743_v12 }
 0x419   : > { %v741_v14 = vpop.permute.xlu1 %740 }
 0x41a   : > { %747 = vst.msk [vmem:[#allocation2] sm:$0xff] %vm746_vm9, %v741_v14 }
 0x41b   : > { %v750_v16 = vld [vmem:[#allocation2 + $0x8] sm:$0xff] }
 0x421   : > { %v749_v15 = vld [vmem:[#allocation2] sm:$0xff] }
 0x422   : > { %v751_v17 = vpack.c.bf16 %v750_v16, %v749_v15 }
 0x424   : > { %954 = vmatmul.msk.bf16.vlgmr.msra.gmra.mxu0 %vm322_vm0, %v751_v17 }
 0x4a1   : > { %v784_v19 = vpop.f32.mrf.mxu0 }
 0x4a2   : > { %v785_v54 = vadd.f32 %v1069_v18, %v784_v19 }
 0x4a4   : > { %789 = vst.msk [vmem:[%s295_s28] sm:$0xff] %vm322_vm0, %v785_v54 }
 0x4a9   : > { %v786_v63 = vpop.f32.mrf.mxu0 }
 0x4aa   : > { %v787_v20 = vadd.f32 %v1069_v18, %v786_v63 }
 0x4ac   : > { %790 = vst.msk [vmem:[%s295_s28 + $0x8] sm:$0xff] %vm322_vm0, %v787_v20 }
 0x4ad   : > { %1219 = shalt.err (!%p1216_p0)
}
 0x4ae   : > { %s1300_s25 = smov 128  }
 0x4af   : > { %976 = dma.vmem_to_hbm [thread:$0]  (%p1414_p7), %s807_s11, 256, %s809_s13, %s792_s14, %s1300_s25, %s1300_s25, %s1297_s27  }
 0x4b0 PF: > { %s823_s1 = sand.u32 1, %s1258_s18   ;;  %p990_p3 = pnand %p920_p11, %p1380_p6 }
 0x4b1   : > { %s824_s3 = scalar_lea.sflag [#allocation5], %s823_s1 }
 0x4b2   : > { %p991_p5 = pneg %p990_p3 }
 0x4b4   : > { %1253 = dma.done.wait (%p991_p5), %s824_s3, 256  }
 0x4b5   : > { %1255 = vsyncadd (%p991_p5), %s824_s3, 4294967040  ;;  %s22_s23 = sadd.s32 1, %s1278_s23   ;;  %s1628_s6 = sld [smem:[#allocation13_spill]] }
 0x4b6   : > { %p19_p9 = scmp.ge.s32.totalorder %s22_s23, 4   ;;  %s1629_s18 = smov %s1262_s19 }
 0x4b7   : > { %s1630_s19 = smov %s1266_s20  ;;  %s1631_s20 = smov %s1423_s12 }
 0x4b8   : > { %s1632_s21 = smov %s1274_s22  ;;  %21 = sbr.rel (!%p19_p9) target bundleno = 10 (0xa), region = 93 }
 0x4bb   : > { %s1633_s22 = smov %s1628_s6 }
 0x4bd   :  { %830 = vsyncpa [#allocation4], 1 }
 0x4be   :  { %832 = vsyncpa [#allocation4 + $0x1], 1 }
 0x4bf   :  { %833 = vsyncpa [#allocation7], 1 }
 0x4c0   :  { %834 = vsyncpa [#allocation5], 1 }
 0x4c1   :  { %836 = vsyncpa [#allocation5 + $0x1], 1 }

</bundles_post_ra>
